<compile_context>
chip_gen: v5e
topology: v5e:2x2
jax: 0.10.0
libtpu: 0.0.40
codegen_flags: <defaults>
</compile_context>

<pallas_src>
import jax
import jax.numpy as jnp
from jax.experimental import pallas as pl
from jax.experimental.pallas import tpu as pltpu


def _linear_kernel(x_ref, w_ref, b_ref, o_ref):
    # x_ref: (TB, D) VMEM (streamed) | w_ref: (1, D) VMEM (grid-resident)
    # b_ref: (1, 1) SMEM scalar      | o_ref: (1, 1, TB) VMEM (lane-dense row)
    tb, d = x_ref.shape
    LANES = 128
    n_chunks, rem = divmod(d, LANES)

    # Chunked lane-group fold on the VPU: live intermediate stays (TB, 128).
    acc = jnp.zeros((tb, LANES), jnp.float32)
    for c in range(n_chunks):  # static, fully unrolled (D // 128 = 6 for D=768)
        lo, hi = c * LANES, (c + 1) * LANES
        acc = acc + (x_ref[:, lo:hi].astype(jnp.float32) *
                     w_ref[:, lo:hi].astype(jnp.float32))

    row = jnp.sum(acc, axis=-1)  # (TB,)  -- single cross-lane XLU reduce
    if rem:  # tail chunk (not hit for D=768); handled for generality
        lo = n_chunks * LANES
        row = row + jnp.sum(x_ref[:, lo:].astype(jnp.float32) *
                            w_ref[:, lo:].astype(jnp.float32), axis=-1)

    row = row + b_ref[0, 0]                      # scalar bias add in f32
    o_ref[...] = row.reshape(1, 1, tb).astype(o_ref.dtype)


def linear_model_forward(x, weight, bias, *, block_rows=None, min_pallas_batch=1024):
    """x: (B, D); weight: (1, D) (PyTorch nn.Linear layout); bias: (1,)."""
    B, D = x.shape
    w = weight.reshape(1, D)                     # keep PyTorch layout
    b = bias.reshape(1, 1).astype(jnp.float32)

    # Tiny batches: fixed pallas_call / pipeline prologue dominates -> plain XLA.
    if B <= min_pallas_batch:
        return (jnp.dot(x.astype(jnp.float32), w.astype(jnp.float32).T)
                + b).astype(x.dtype)

    # Tile size: full batch if it fits in one tile, otherwise a 128-aligned
    # streaming tile (default 2048 rows; use 4096 on v7x for very large B).
    if block_rows is None:
        block_rows = 2048
    if block_rows >= B:
        tb = B                                   # single full-extent block (always legal)
    else:
        tb = max(128, (block_rows // 128) * 128)  # (8,128)-aligned streaming tile
        tb = min(tb, B)
    num_tiles = pl.cdiv(B, tb)

    itemsize = jnp.dtype(x.dtype).itemsize
    cost = pl.CostEstimate(
        flops=2 * B * D,
        transcendentals=0,
        bytes_accessed=B * D * itemsize
        + D * jnp.dtype(w.dtype).itemsize
        + B * itemsize
        + 4,
    )

    out_padded = pl.pallas_call(
        _linear_kernel,
        out_shape=jax.ShapeDtypeStruct((num_tiles, 1, tb), x.dtype),
        grid_spec=pl.GridSpec(
            grid=(num_tiles,),
            in_specs=[
                pl.BlockSpec((tb, D), lambda i: (i, 0)),               # x: streamed
                pl.BlockSpec((1, D), lambda i: (0, 0)),                # weight: resident
                pl.BlockSpec(memory_space=pltpu.MemorySpace.SMEM),     # bias: SMEM scalar
            ],
            # Lane-dense output row per tile -> unmasked vst, tiny out buffers.
            out_specs=pl.BlockSpec((1, 1, tb), lambda i: (i, 0, 0)),
        ),
        compiler_params=pltpu.CompilerParams(
            dimension_semantics=("parallel",),        # shard tiles across v7x's 2 TCs
            vmem_limit_bytes=32 * 1024 * 1024,        # covers TB=2048 double-buffered on v5e
        ),
        cost_estimate=cost,
    )(x, w, b)

    # Trim tile padding back to the (B, 1) PyTorch output shape.
    return out_padded.reshape(-1)[:B].reshape(B, 1)


if __name__ == "__main__":
    dim = 768  # matches LinearModel default

    key = jax.random.PRNGKey(0)
    kx, kw, kb = jax.random.split(key, 3)

    # Deterministic PyTorch-style uniform(-1/sqrt(dim), 1/sqrt(dim)) init.
    bound = 1.0 / (dim ** 0.5)
    weight = jax.random.uniform(kw, (1, dim), jnp.float32, -bound, bound)
    bias = jax.random.uniform(kb, (1,), jnp.float32, -bound, bound)

    # Multi-tile path (2 tiles of 128 rows, last one partial -> exercises tail trim).
    batch = 200
    x = jax.random.normal(kx, (batch, dim), jnp.float32)
    out = jax.block_until_ready(
        linear_model_forward(x, weight, bias, block_rows=128, min_pallas_batch=0))
    ref = x @ weight.T + bias
    assert out.shape == (batch, 1)
    assert jnp.allclose(out, ref, atol=1e-4, rtol=1e-4)

    # Single full-batch-tile path at a tiny batch (still through the Pallas kernel).
    x2 = jax.random.normal(kb, (8, dim), jnp.float32)
    out2 = jax.block_until_ready(
        linear_model_forward(x2, weight, bias, min_pallas_batch=0))
    assert out2.shape == (8, 1)
    assert jnp.allclose(out2, x2 @ weight.T + bias, atol=1e-4, rtol=1e-4)

    print("KERNEL_OK")
</pallas_src>

<mosaic_0001>
module attributes {stable_mosaic.version = 11 : i64} {
  func.func @_linear_kernel(%arg0: i32, %arg1: memref<128x768xf32, #tpu.memory_space<vmem>>, %arg2: memref<1x768xf32, #tpu.memory_space<vmem>>, %arg3: memref<1x1xf32, #tpu.memory_space<smem>>, %arg4: memref<1x1x128xf32, #tpu.memory_space<vmem>>) attributes {dimension_semantics = [#tpu.dimension_semantics<parallel>], iteration_bounds = array<i64: 2>, scalar_prefetch = 0 : i64, scratch_operands = 0 : i64, tpu.core_type = #tpu.core_type<tc>, window_params = [{transform_indices = @transform_0, window_bounds = array<i64: 128, 768>}, {pipeline_mode = #tpu.pipeline_mode<synchronous>, transform_indices = @transform_1, window_bounds = array<i64: 1, 768>}, {transform_indices = @transform_2, window_bounds = array<i64: 1, 1>}, {transform_indices = @transform_3, window_bounds = array<i64: 1, 1, 128>}]} {
    %cst = arith.constant 0.000000e+00 : f32
    %0 = vector.broadcast %cst : f32 to vector<128x128xf32>
    %c0 = arith.constant 0 : index
    %c0_0 = arith.constant 0 : index
    %1 = vector.load %arg1[%c0, %c0_0] : memref<128x768xf32, #tpu.memory_space<vmem>>, vector<128x128xf32>
    %c0_1 = arith.constant 0 : index
    %c0_2 = arith.constant 0 : index
    %2 = vector.load %arg2[%c0_1, %c0_2] : memref<1x768xf32, #tpu.memory_space<vmem>>, vector<1x128xf32>
    %3 = vector.broadcast %2 : vector<1x128xf32> to vector<128x128xf32>
    %4 = arith.mulf %1, %3 : vector<128x128xf32>
    %5 = arith.addf %0, %4 : vector<128x128xf32>
    %c0_3 = arith.constant 0 : index
    %c128 = arith.constant 128 : index
    %6 = vector.load %arg1[%c0_3, %c128] : memref<128x768xf32, #tpu.memory_space<vmem>>, vector<128x128xf32>
    %c0_4 = arith.constant 0 : index
    %c128_5 = arith.constant 128 : index
    %7 = vector.load %arg2[%c0_4, %c128_5] : memref<1x768xf32, #tpu.memory_space<vmem>>, vector<1x128xf32>
    %8 = vector.broadcast %7 : vector<1x128xf32> to vector<128x128xf32>
    %9 = arith.mulf %6, %8 : vector<128x128xf32>
    %10 = arith.addf %5, %9 : vector<128x128xf32>
    %c0_6 = arith.constant 0 : index
    %c256 = arith.constant 256 : index
    %11 = vector.load %arg1[%c0_6, %c256] : memref<128x768xf32, #tpu.memory_space<vmem>>, vector<128x128xf32>
    %c0_7 = arith.constant 0 : index
    %c256_8 = arith.constant 256 : index
    %12 = vector.load %arg2[%c0_7, %c256_8] : memref<1x768xf32, #tpu.memory_space<vmem>>, vector<1x128xf32>
    %13 = vector.broadcast %12 : vector<1x128xf32> to vector<128x128xf32>
    %14 = arith.mulf %11, %13 : vector<128x128xf32>
    %15 = arith.addf %10, %14 : vector<128x128xf32>
    %c0_9 = arith.constant 0 : index
    %c384 = arith.constant 384 : index
    %16 = vector.load %arg1[%c0_9, %c384] : memref<128x768xf32, #tpu.memory_space<vmem>>, vector<128x128xf32>
    %c0_10 = arith.constant 0 : index
    %c384_11 = arith.constant 384 : index
    %17 = vector.load %arg2[%c0_10, %c384_11] : memref<1x768xf32, #tpu.memory_space<vmem>>, vector<1x128xf32>
    %18 = vector.broadcast %17 : vector<1x128xf32> to vector<128x128xf32>
    %19 = arith.mulf %16, %18 : vector<128x128xf32>
    %20 = arith.addf %15, %19 : vector<128x128xf32>
    %c0_12 = arith.constant 0 : index
    %c512 = arith.constant 512 : index
    %21 = vector.load %arg1[%c0_12, %c512] : memref<128x768xf32, #tpu.memory_space<vmem>>, vector<128x128xf32>
    %c0_13 = arith.constant 0 : index
    %c512_14 = arith.constant 512 : index
    %22 = vector.load %arg2[%c0_13, %c512_14] : memref<1x768xf32, #tpu.memory_space<vmem>>, vector<1x128xf32>
    %23 = vector.broadcast %22 : vector<1x128xf32> to vector<128x128xf32>
    %24 = arith.mulf %21, %23 : vector<128x128xf32>
    %25 = arith.addf %20, %24 : vector<128x128xf32>
    %c0_15 = arith.constant 0 : index
    %c640 = arith.constant 640 : index
    %26 = vector.load %arg1[%c0_15, %c640] : memref<128x768xf32, #tpu.memory_space<vmem>>, vector<128x128xf32>
    %c0_16 = arith.constant 0 : index
    %c640_17 = arith.constant 640 : index
    %27 = vector.load %arg2[%c0_16, %c640_17] : memref<1x768xf32, #tpu.memory_space<vmem>>, vector<1x128xf32>
    %28 = vector.broadcast %27 : vector<1x128xf32> to vector<128x128xf32>
    %29 = arith.mulf %26, %28 : vector<128x128xf32>
    %30 = arith.addf %25, %29 : vector<128x128xf32>
    %cst_18 = arith.constant dense<0.000000e+00> : vector<128xf32>
    %31 = vector.multi_reduction <add>, %30, %cst_18 [1] : vector<128x128xf32> to vector<128xf32>
    %c0_19 = arith.constant 0 : index
    %c0_20 = arith.constant 0 : index
    %32 = memref.load %arg3[%c0_19, %c0_20] : memref<1x1xf32, #tpu.memory_space<smem>>
    %33 = vector.broadcast %32 : f32 to vector<128xf32>
    %34 = arith.addf %31, %33 : vector<128xf32>
    %35 = vector.shape_cast %34 : vector<128xf32> to vector<1x1x128xf32>
    %c0_21 = arith.constant 0 : index
    %c0_22 = arith.constant 0 : index
    %c0_23 = arith.constant 0 : index
    %36 = vector.load %arg4[%c0_21, %c0_22, %c0_23] : memref<1x1x128xf32, #tpu.memory_space<vmem>>, vector<1x1x128xf32>
    tpu.vector_store %arg4[%c0_21, %c0_22, %c0_23], %35 {strides = array<i32>} : memref<1x1x128xf32, #tpu.memory_space<vmem>>, vector<1x1x128xf32>,
    return
  }
  func.func @transform_0(%arg0: i32) -> (i32, i32) {
    %c0_i32 = arith.constant 0 : i32
    %c0_i32_0 = arith.constant 0 : i32
    return %arg0, %c0_i32 : i32, i32
  }
  func.func @transform_1(%arg0: i32) -> (i32, i32) {
    %c0_i32 = arith.constant 0 : i32
    %c0_i32_0 = arith.constant 0 : i32
    %c0_i32_1 = arith.constant 0 : i32
    return %c0_i32, %c0_i32_0 : i32, i32
  }
  func.func @transform_2(%arg0: i32) -> (i32, i32) {
    %c0_i32 = arith.constant 0 : i32
    %c0_i32_0 = arith.constant 0 : i32
    %c0_i32_1 = arith.constant 0 : i32
    return %c0_i32, %c0_i32_0 : i32, i32
  }
  func.func @transform_3(%arg0: i32) -> (i32, i32, i32) {
    %c0_i32 = arith.constant 0 : i32
    %c0_i32_0 = arith.constant 0 : i32
    %c0_i32_1 = arith.constant 0 : i32
    return %arg0, %c0_i32, %c0_i32_0 : i32, i32, i32
  }
}

</mosaic_0001>

<bundles_post_ra>
// kernel: tpu_custom_call.1
= control target key start
LH: loop header
LB: loop body
LE: loop exit
PB: predicated region body
PF: predicated region fallthrough
CT: control target
= control target key end

     0   :  { %s1407_s0 = inlined_call_operand.hbm [shape: f32[200,768], index: 0, kind: input, shape index: {}]   ;;  %s1408_s1 = inlined_call_operand.hbm [shape: f32[1,768], index: 1, kind: input, shape index: {}]   ;;  %s1409_s2 = inlined_call_operand.<no memory space> [shape: f32[1,1], index: 2, kind: input, shape index: {}]   ;;  %s1410_s3 = inlined_call_operand.hbm [shape: f32[2,1,128], index: 3, kind: output, shape index: {}]  }
   0x1   :  { %8 = sst [smem:[#allocation2]] %s1409_s2 }
   0x2   :  { %9 = vsyncpa [#allocation4], 0 }
   0x3   :  { %11 = vsyncpa [#allocation4 + $0x1], 0 }
   0x4   :  { %12 = vsyncpa [#allocation7], 0 }
   0x5   :  { %13 = vsyncpa [#allocation5], 0 }
   0x6   :  { %15 = vsyncpa [#allocation5 + $0x1], 0  ;;  %s998_s14 = smov 0   ;;  %s1000_s15 = smov 0  }
   0x7   :  { %s1002_s16 = smov 0   ;;  %s1004_s17 = smov 0  }
   0x8 LB: > { %s1019_s2 = sadd.s32 4294967295, %s969_s17   ;;  %s753_s18 = sadd.s32 4294967294, %s969_s17   ;;  %s969_s17 = sphi %s1004_s17, %s1426_s17   ;;  %s965_s16 = sphi %s1002_s16, %s1425_s16   ;;  %s961_s15 = sphi %s1000_s15, %s1424_s15   ;;  %s957_s14 = sphi %s998_s14, %s1423_s14  }
   0x9   : > { %s1023_s19 = sadd.s32 1, %s969_s17   ;;  %s28_s20 = sadd.s32 1, %s965_s16 }
   0xa   : > { %s25_s21 = ssub.s32 %s969_s17, %s1023_s19  ;;  %p35_p0 = scmp.ne.s32.totalorder %s965_s16, %s961_s15 }
   0xb   : > { %p26_p1 = scmp.eq.s32.totalorder %s25_s21, 0  ;;  %p36_p2 = scmp.eq.s32.totalorder %s969_s17, 0 }
   0xc   : > { %p41_p3 = scmp.ne.s32.totalorder %s961_s15, %s957_s14  ;;  %p1412_p4 = scmp.eq.s32.totalorder %s1019_s2, 0 }
   0xd   : > { %s1035_s22 = scalar_select %p26_p1, %s965_s16, %s28_s20  }
   0xe   : > { %p1037_p5 = por %p36_p2, %p35_p0  ;;  %p1043_p6 = por %p1412_p4, %p41_p3 }
   0xf   : > { %p107_p7 = scmp.eq.s32.totalorder %s1019_s2, 1  ;;  %p113_p8 = scmp.eq.s32.totalorder %s753_s18, 1 }
  0x10   : > { %p754_p9 = scmp.ge.s32.totalorder %s969_s17, 1  ;;  %p120_p10 = scmp.lt.s32.totalorder %s969_s17, 3 }
  0x11   : > { %p1050_p11 = por %p107_p7, %p35_p0  ;;  %p1054_p12 = por %p113_p8, %p41_p3 }
  0x12   : > { %p1058_p13 = pnand %p754_p9, %p120_p10  ;;  %s132_s30 = sshll.u32 %s1408_s1, 4  ;;  %s133_s30 = int_to_ptr.hbm [resolvable:$true] %s132_s30 }
  0x13   : > { %s1416_s26 = scalar_select %p1054_p12, 1, 0 }
  0x14   : > { %p778_p1 = pneg %p1058_p13  ;;  %s971_s4 = smov [#allocation6]  }
  0x15   : > { %s134_s5 = sshll.u32 %s971_s4, 4  ;;  %p1411_p2 = scmp.ge.s32.totalorder %s969_s17, 2  ;;  %s135_s5 = int_to_ptr.vmem [resolvable:$true] %s134_s5 }
  0x16   : > { %p779_p0 = pnand %p778_p1, %p1412_p4 }
  0x17   : > { %144 = sbr.rel (%p1411_p2) target bundleno = 69 (0x45), region = 24 }
  0x18   : > { %781 = dma.hbm_to_vmem [thread:$0]  (!%p779_p0), %s133_s30, 96, %s135_s5, [#allocation7]  }
  0x1c   : > { %147 = sbr.rel (!%p1037_p5) target bundleno = 69 (0x45), region = 28  ;;  %s148_s6 = sand.u32 (%p1037_p5), 1, %s965_s16  }
  0x1d   : > { %s757_s7 = sshll.u32 (%p1037_p5), %s969_s17, 4  ;;  %s768_s8 = smul.u32 (%p1037_p5), 768, %s148_s6 }
  0x1e   : > { %s154_s9 = ssub.s32 (%p1037_p5), 25, %s757_s7  ;;  %s1076_s13 = scalar_lea.sflag (%p1037_p5), [#allocation4], %s148_s6 }
  0x1f   : > { %p155_p3 = scmp.lt.s32.totalorder (%p1037_p5), %s154_s9, 16  ;;  %s152_s18 = scalar_lea.vmem (%p1037_p5), [#allocation3], %s768_s8 }
  0x21   : > { %s1428_s9 = smov (!%p155_p3, %s154_s9), 16 }
  0x22   : > { %s759_s10 = smul.u32 48, %s1428_s9 }
  0x24   : > { %s159_s11 = ssub.s32 768, %s759_s10 }
  0x25   : > { %s160_s12 = sshll.u32 %s159_s11, 4 }
  0x26   : > { %161 = vsyncadd %s1076_s13, %s160_s12  ;;  %p1079_p7 = scmp.ne.s32.totalorder %s759_s10, 0  ;;  %s769_s21 = smul.u32 768, %s969_s17 }
  0x27   : > { %s1084_s23 = sshll.u32 %s152_s18, 4  ;;  %s1086_s28 = smul.u32 768, %s1428_s9  ;;  %s170_s23 = int_to_ptr.vmem [resolvable:$true] %s1084_s23 }
  0x28   : > { %s165_s4 = scalar_lea.hbm %s1407_s0, %s769_s21  ;;  %s871_s18 = scalar_lea.hbm %s1407_s0, 1200 }
  0x29   : > { %s167_s5 = sshll.u32 %s165_s4, 4  ;;  %s862_s7 = sshrl.u32 %s1086_s28, 4  ;;  %s1092_s5 = int_to_ptr.hbm [resolvable:$true] %s167_s5 }
  0x2a   : > { %s860_s6 = sshra.s32 %s1092_s5, 4  ;;  %s898_s8 = sshll.u32 %s862_s7, 4  ;;  %s861_s6 = int_to_ptr.hbm [resolvable:$true] %s860_s6 }
  0x2b   : > { %p864_p5 = scmp.ne.s32.totalorder %s898_s8, %s1086_s28  ;;  %s865_s10 = sadd.s32 1, %s862_s7 }
  0x2c   : > { %p872_p1 = scmp.lt.s32.totalorder %s861_s6, %s1407_s0 }
  0x2d   : > { %s1430_s10 = smov (!%p864_p5, %s865_s10), %s862_s7 }
  0x2e   : > { %s867_s9 = scalar_lea.hbm %s861_s6, %s1430_s10 }
  0x2f   : > { %p868_p8 = scmp.ne.s32.totalorder %s861_s6, %s867_s9  ;;  %p873_p0 = scmp.lt.s32.totalorder %s871_s18, %s867_s9 }
  0x31   : > { %p869_p9 = pnand %p868_p8, %p1079_p7  ;;  %p874_p3 = por %p873_p0, %p872_p1 }
  0x33   : > { %p870_p10 = pneg %p869_p9 }
  0x35   : > { %p875_p2 = pnand %p874_p3, %p870_p10 }
  0x37   : > { %878 = shalt.err (!%p875_p2)
}
  0x38   : > { %s879_s30 = sshra.s32 %s170_s23, 4  ;;  %s972_s7 = smov [#allocation3]   ;;  %s880_s30 = int_to_ptr.vmem [resolvable:$true] %s879_s30 }
  0x39   : > { %s886_s4 = scalar_lea.vmem %s880_s30, %s1430_s10  ;;  %s890_s8 = scalar_lea.vmem %s972_s7, 1536 }
  0x3a   : > { %p887_p5 = scmp.ne.s32.totalorder %s880_s30, %s886_s4  ;;  %p892_p4 = scmp.lt.s32.totalorder %s890_s8, %s886_s4 }
  0x3c   : > { %p888_p8 = pnand %p887_p5, %p1079_p7 }
  0x3e   : > { %p889_p9 = pneg %p888_p8 }
  0x40   : > { %p894_p12 = pnand %p892_p4, %p889_p9 }
  0x42   : > { %897 = shalt.err (!%p894_p12)
}
  0x43   : > { %s973_s6 = smov 768   ;;  %s974_s9 = smov 48  }
  0x44   : > { %175 = dma.hbm_to_vmem [thread:$0]  (%p1079_p7), %s1092_s5, %s1086_s28, %s170_s23, %s1076_s13, %s973_s6, %s973_s6, %s974_s9  }
  0x45 PF: > { %181 = sbr.rel (%p1058_p13) target bundleno = 257 (0x101), region = 32  ;;  %s1119_s10 = sand.u32 (!%p1058_p13), 1, %s961_s15  }
  0x46   : > { %s770_s11 = smul.u32 (!%p1058_p13), 768, %s1119_s10  ;;  %s184_s12 = scalar_lea.sflag (!%p1058_p13), [#allocation4], %s1119_s10 }
  0x48   : > { %s1123_s18 = scalar_lea.vmem (!%p1058_p13), [#allocation3], %s770_s11 }
  0x4a   : > { %944 = dma.done.wait (%p1043_p6), %s184_s12, 12288  }
  0x4b   : > { %946 = vsyncadd (%p1043_p6), %s184_s12, 4294955008  ;;  %p1419_p4 = scmp.eq.s32.totalorder %s1019_s2, 0 }
  0x4d   : > { %948 = dma.done.wait (%p1419_p4), [#allocation7], 96   ;;  %p1420_p12 = pmov %p1419_p4 }
  0x4e   : > { %v221_v0 = vld [vmem:[%s1123_s18] sm:$0xff]  ;;  %v273_v2 = vld [vmem:[%s1123_s18 + $0x8] sm:$0xff]  ;;  %v325_v5 = vld [vmem:[%s1123_s18 + $0x10] sm:$0xff]  ;;  %s565_s24 = sld [smem:[#allocation2]]  ;;  %vm604_vm0 = vcmask 130112   ;;  %vm608_vm1 = vcmask 195712   ;;  %s673_s20 = scalar_lea.hbm %s1410_s3, %s1019_s2 }
  0x4f   : > { %950 = vsyncadd (%p1420_p12), [#allocation7], 4294967200  ;;  %v1134_v1 = vld [vmem:[#allocation6] ss:$0 sm:$0xff]  ;;  %v1137_v3 = vld [vmem:[#allocation6 + $0x1] ss:$0 sm:$0xff] }
  0x50   : > { %v241_v4 = vmul.f32 %v1134_v1, %v221_v0  ;;  %v1141_v6 = vld [vmem:[#allocation6 + $0x2] ss:$0 sm:$0xff]  ;;  %v293_v7 = vmul.f32 %v1137_v3, %v273_v2  ;;  %v377_v8 = vld [vmem:[%s1123_s18 + $0x18] sm:$0xff]  ;;  %v1145_v9 = vld [vmem:[#allocation6 + $0x3] ss:$0 sm:$0xff]  ;;  %vm612_vm2 = vcmask 261312  }
  0x51   : > { %v345_v10 = vmul.f32 %v1141_v6, %v325_v5  ;;  %v429_v11 = vld [vmem:[%s1123_s18 + $0x20] sm:$0xff]  ;;  %v397_v14 = vmul.f32 %v1145_v9, %v377_v8  ;;  %v481_v15 = vld [vmem:[%s1123_s18 + $0x28] sm:$0xff]  ;;  %v327_v19 = vld [vmem:[%s1123_s18 + $0x70] sm:$0xff]  ;;  %vm616_vm3 = vcmask 326912   ;;  %vm620_vm4 = vcmask 392512   ;;  %s214_s23 = scalar_lea.vmem [#allocation8], %s1119_s10 }
  0x52   : > { %v1149_v12 = vld [vmem:[#allocation6 + $0x4] ss:$0 sm:$0xff]  ;;  %v309_v13 = vadd.f32 %v293_v7, %v241_v4  ;;  %v1153_v16 = vld [vmem:[#allocation6 + $0x5] ss:$0 sm:$0xff]  ;;  %v275_v18 = vld [vmem:[%s1123_s18 + $0x68] sm:$0xff]  ;;  %v347_v28 = vmul.f32 %v1141_v6, %v327_v19  ;;  %vm624_vm5 = vcmask 458112  }
  0x53   : > { %v223_v17 = vld [vmem:[%s1123_s18 + $0x60] sm:$0xff]  ;;  %v449_v21 = vmul.f32 %v1149_v12, %v429_v11  ;;  %v295_v23 = vmul.f32 %v1137_v3, %v275_v18  ;;  %v379_v24 = vld [vmem:[%s1123_s18 + $0x78] sm:$0xff]  ;;  %v483_v26 = vld [vmem:[%s1123_s18 + $0x88] sm:$0xff]  ;;  %v501_v27 = vmul.f32 %v1153_v16, %v481_v15  ;;  %vm628_vm6 = vcmask 523712   ;;  %s675_s28 = sshll.u32 %s214_s23, 4  ;;  %s677_s5 = sshll.u32 %s673_s20, 4  ;;  %s676_s28 = int_to_ptr.vmem [resolvable:$true] %s675_s28  ;;  %s678_s5 = int_to_ptr.hbm [resolvable:$true] %s677_s5 }
  0x54   : > { %v361_v20 = vadd.f32 %v345_v10, %v309_v13  ;;  %v243_v22 = vmul.f32 %v1134_v1, %v223_v17  ;;  %v431_v25 = vld [vmem:[%s1123_s18 + $0x80] sm:$0xff]  ;;  %v399_v29 = vmul.f32 %v1145_v9, %v379_v24  ;;  %v277_v31 = vld [vmem:[%s1123_s18 + $0xc8] sm:$0xff]  ;;  %v329_v32 = vld [vmem:[%s1123_s18 + $0xd0] sm:$0xff]  ;;  %v503_v41 = vmul.f32 %v1153_v16, %v483_v26  ;;  %s665_s2 = scalar_lea.sflag [#allocation5], %s1119_s10  ;;  %s913_s21 = sshra.s32 %s678_s5, 4  ;;  %s914_s21 = int_to_ptr.hbm [resolvable:$true] %s913_s21 }
  0x55   : > { %v225_v30 = vld [vmem:[%s1123_s18 + $0xc0] sm:$0xff]  ;;  %v297_v36 = vmul.f32 %v1137_v3, %v277_v31  ;;  %v381_v37 = vld [vmem:[%s1123_s18 + $0xd8] sm:$0xff]  ;;  %v485_v39 = vld [vmem:[%s1123_s18 + $0xe8] sm:$0xff]  ;;  %v451_v40 = vmul.f32 %v1149_v12, %v431_v25  ;;  %v349_v42 = vmul.f32 %v1141_v6, %v329_v32  ;;  %vm632_vm7 = vcmask 589312   ;;  %s915_s29 = scalar_lea.hbm %s914_s21, 1  ;;  %s919_s7 = scalar_lea.hbm %s1410_s3, 2 }
  0x56   : > { %v413_v33 = vadd.f32 %v397_v14, %v361_v20  ;;  %v311_v34 = vadd.f32 %v295_v23, %v243_v22  ;;  %v245_v35 = vmul.f32 %v1134_v1, %v225_v30  ;;  %v433_v38 = vld [vmem:[%s1123_s18 + $0xe0] sm:$0xff]  ;;  %v401_v43 = vmul.f32 %v1145_v9, %v381_v37  ;;  %v222_v44 = vld [vmem:[%s1123_s18 + $0x30] sm:$0xff]  ;;  %v274_v45 = vld [vmem:[%s1123_s18 + $0x38] sm:$0xff]  ;;  %p916_p6 = scmp.ne.s32.totalorder %s914_s21, %s915_s29  ;;  %p920_p7 = scmp.lt.s32.totalorder %s914_s21, %s1410_s3 }
  0x57   : > { %v326_v46 = vld [vmem:[%s1123_s18 + $0x40] sm:$0xff]  ;;  %v242_v50 = vmul.f32 %v1134_v1, %v222_v44  ;;  %v378_v51 = vld [vmem:[%s1123_s18 + $0x48] sm:$0xff]  ;;  %v430_v52 = vld [vmem:[%s1123_s18 + $0x50] sm:$0xff]  ;;  %v453_v54 = vmul.f32 %v1149_v12, %v433_v38  ;;  %v505_v55 = vmul.f32 %v1153_v16, %v485_v39  ;;  %v294_v56 = vmul.f32 %v1137_v3, %v274_v45  ;;  %p921_p10 = scmp.lt.s32.totalorder %s919_s7, %s915_s29 }
  0x58   : > { %v465_v47 = vadd.f32 %v449_v21, %v413_v33  ;;  %v363_v48 = vadd.f32 %v347_v28, %v311_v34  ;;  %v313_v49 = vadd.f32 %v297_v36, %v245_v35  ;;  %v482_v53 = vld [vmem:[%s1123_s18 + $0x58] sm:$0xff]  ;;  %v346_v57 = vmul.f32 %v1141_v6, %v326_v46  ;;  %v224_v58 = vld [vmem:[%s1123_s18 + $0x90] sm:$0xff]  ;;  %v328_v60 = vld [vmem:[%s1123_s18 + $0xa0] sm:$0xff]  ;;  %p917_p13 = pnand %p916_p6, %p1050_p11 }
  0x59   : > { %v276_v59 = vld [vmem:[%s1123_s18 + $0x98] sm:$0xff]  ;;  %v398_v0 = vmul.f32 %v1145_v9, %v378_v51  ;;  %v380_v2 = vld [vmem:[%s1123_s18 + $0xa8] sm:$0xff]  ;;  %v310_v4 = vadd.f32 %v294_v56, %v242_v50  ;;  %v244_v5 = vmul.f32 %v1134_v1, %v224_v58  ;;  %v348_v8 = vmul.f32 %v1141_v6, %v328_v60  ;;  %v226_v10 = vld [vmem:[%s1123_s18 + $0xf0] sm:$0xff]  ;;  %p922_p1 = por %p921_p10, %p920_p7 }
  0x5a   : > { %v517_v61 = vadd.f32 %v501_v27, %v465_v47  ;;  %v415_v62 = vadd.f32 %v399_v29, %v363_v48  ;;  %v365_v63 = vadd.f32 %v349_v42, %v313_v49  ;;  %v296_v7 = vmul.f32 %v1137_v3, %v276_v59  ;;  %v278_v11 = vld [vmem:[%s1123_s18 + $0xf8] sm:$0xff]  ;;  %v330_v13 = vld [vmem:[%s1123_s18 + $0x100] sm:$0xff]  ;;  %v432_v19 = vld [vmem:[%s1123_s18 + $0xb0] sm:$0xff]  ;;  %p918_p2 = pneg %p917_p13 }
  0x5b   : > { %v450_v17 = vmul.f32 %v1149_v12, %v430_v52  ;;  %v502_v18 = vmul.f32 %v1153_v16, %v482_v53  ;;  %v484_v20 = vld [vmem:[%s1123_s18 + $0xb8] sm:$0xff]  ;;  %v362_v21 = vadd.f32 %v346_v57, %v310_v4  ;;  %v400_v23 = vmul.f32 %v1145_v9, %v380_v2  ;;  %v382_v25 = vld [vmem:[%s1123_s18 + $0x108] sm:$0xff]  ;;  %v227_v26 = vld [vmem:[%s1123_s18 + $0x120] sm:$0xff] }
  0x5c   : > { %533 = vadd.xlane.f32.xlu0 %v517_v61  ;;  %v467_v14 = vadd.f32 %v451_v40, %v415_v62  ;;  %v417_v15 = vadd.f32 %v401_v43, %v365_v63  ;;  %v312_v22 = vadd.f32 %v296_v7, %v244_v5  ;;  %v246_v24 = vmul.f32 %v1134_v1, %v226_v10  ;;  %v279_v31 = vld [vmem:[%s1123_s18 + $0x128] sm:$0xff]  ;;  %v331_v32 = vld [vmem:[%s1123_s18 + $0x130] sm:$0xff]  ;;  %v486_v38 = vld [vmem:[%s1123_s18 + $0x118] sm:$0xff]  ;;  %p923_p0 = pnand %p922_p1, %p918_p2 }
  0x5d   : > { %v298_v29 = vmul.f32 %v1137_v3, %v278_v11  ;;  %v350_v30 = vmul.f32 %v1141_v6, %v330_v13  ;;  %v414_v33 = vadd.f32 %v398_v0, %v362_v21  ;;  %v452_v35 = vmul.f32 %v1149_v12, %v432_v19  ;;  %v434_v37 = vld [vmem:[%s1123_s18 + $0x110] sm:$0xff]  ;;  %v383_v39 = vld [vmem:[%s1123_s18 + $0x138] sm:$0xff]  ;;  %v435_v49 = vld [vmem:[%s1123_s18 + $0x140] sm:$0xff] }
  0x5e   : > { %v519_v27 = vadd.f32 %v503_v41, %v467_v14  ;;  %v469_v28 = vadd.f32 %v453_v54, %v417_v15  ;;  %v364_v34 = vadd.f32 %v348_v8, %v312_v22  ;;  %v504_v36 = vmul.f32 %v1153_v16, %v484_v20  ;;  %v228_v44 = vld [vmem:[%s1123_s18 + $0x150] sm:$0xff]  ;;  %v280_v50 = vld [vmem:[%s1123_s18 + $0x158] sm:$0xff]  ;;  %v332_v51 = vld [vmem:[%s1123_s18 + $0x160] sm:$0xff] }
  0x5f   : > { %v314_v41 = vadd.f32 %v298_v29, %v246_v24  ;;  %v402_v42 = vmul.f32 %v1145_v9, %v382_v25  ;;  %v247_v43 = vmul.f32 %v1134_v1, %v227_v26  ;;  %v466_v45 = vadd.f32 %v450_v17, %v414_v33  ;;  %v487_v56 = vld [vmem:[%s1123_s18 + $0x148] sm:$0xff]  ;;  %v229_v62 = vld [vmem:[%s1123_s18 + $0x180] sm:$0xff]  ;;  %v436_v7 = vld [vmem:[%s1123_s18 + $0x170] sm:$0xff] }
  0x60   : > { %537 = vadd.xlane.f32.xlu1 %v519_v27  ;;  %v521_v40 = vadd.f32 %v505_v55, %v469_v28  ;;  %v416_v46 = vadd.f32 %v400_v23, %v364_v34  ;;  %v299_v47 = vmul.f32 %v1137_v3, %v279_v31  ;;  %v351_v48 = vmul.f32 %v1141_v6, %v331_v32  ;;  %v384_v57 = vld [vmem:[%s1123_s18 + $0x168] sm:$0xff]  ;;  %v488_v8 = vld [vmem:[%s1123_s18 + $0x178] sm:$0xff]  ;;  %v333_v10 = vld [vmem:[%s1123_s18 + $0x190] sm:$0xff] }
  0x61   : > { %v366_v52 = vadd.f32 %v350_v30, %v314_v41  ;;  %v454_v53 = vmul.f32 %v1149_v12, %v434_v37  ;;  %v506_v54 = vmul.f32 %v1153_v16, %v486_v38  ;;  %v403_v55 = vmul.f32 %v1145_v9, %v383_v39  ;;  %v281_v63 = vld [vmem:[%s1123_s18 + $0x188] sm:$0xff]  ;;  %v385_v17 = vld [vmem:[%s1123_s18 + $0x198] sm:$0xff]  ;;  %v230_v22 = vld [vmem:[%s1123_s18 + $0x1b0] sm:$0xff] }
  0x62   : > { %541 = vadd.xlane.f32.xlu2 %v521_v40  ;;  %v518_v58 = vadd.f32 %v502_v18, %v466_v45  ;;  %v468_v59 = vadd.f32 %v452_v35, %v416_v46  ;;  %v315_v60 = vadd.f32 %v299_v47, %v247_v43  ;;  %v248_v61 = vmul.f32 %v1134_v1, %v228_v44  ;;  %v282_v23 = vld [vmem:[%s1123_s18 + $0x1b8] sm:$0xff]  ;;  %v334_v24 = vld [vmem:[%s1123_s18 + $0x1c0] sm:$0xff]  ;;  %v489_v30 = vld [vmem:[%s1123_s18 + $0x1a8] sm:$0xff] }
  0x63   : > { %v418_v0 = vadd.f32 %v402_v42, %v366_v52  ;;  %v455_v2 = vmul.f32 %v1149_v12, %v435_v49  ;;  %v300_v4 = vmul.f32 %v1137_v3, %v280_v50  ;;  %v352_v5 = vmul.f32 %v1141_v6, %v332_v51  ;;  %v437_v29 = vld [vmem:[%s1123_s18 + $0x1a0] sm:$0xff]  ;;  %v386_v35 = vld [vmem:[%s1123_s18 + $0x1c8] sm:$0xff]  ;;  %v335_v42 = vld [vmem:[%s1123_s18 + $0x1f0] sm:$0xff] }
  0x64   : > { %535 = vadd.xlane.f32.xlu0 %v518_v58  ;;  %v520_v11 = vadd.f32 %v504_v36, %v468_v59  ;;  %v367_v13 = vadd.f32 %v351_v48, %v315_v60  ;;  %v507_v14 = vmul.f32 %v1153_v16, %v487_v56  ;;  %v404_v15 = vmul.f32 %v1145_v9, %v384_v57  ;;  %v231_v36 = vld [vmem:[%s1123_s18 + $0x1e0] sm:$0xff]  ;;  %v283_v41 = vld [vmem:[%s1123_s18 + $0x1e8] sm:$0xff]  ;;  %v438_v47 = vld [vmem:[%s1123_s18 + $0x1d0] sm:$0xff] }
  0x65   : > { %v470_v18 = vadd.f32 %v454_v53, %v418_v0  ;;  %v316_v19 = vadd.f32 %v300_v4, %v248_v61  ;;  %v249_v20 = vmul.f32 %v1134_v1, %v229_v62  ;;  %v301_v21 = vmul.f32 %v1137_v3, %v281_v63  ;;  %v490_v48 = vld [vmem:[%s1123_s18 + $0x1d8] sm:$0xff]  ;;  %v439_v59 = vld [vmem:[%s1123_s18 + $0x200] sm:$0xff]  ;;  %v491_v4 = vld [vmem:[%s1123_s18 + $0x208] sm:$0xff] }
  0x66   : > { %v419_v25 = vadd.f32 %v403_v55, %v367_v13  ;;  %v456_v26 = vmul.f32 %v1149_v12, %v436_v7  ;;  %v508_v27 = vmul.f32 %v1153_v16, %v488_v8  ;;  %v353_v28 = vmul.f32 %v1141_v6, %v333_v10  ;;  %v387_v49 = vld [vmem:[%s1123_s18 + $0x1f8] sm:$0xff]  ;;  %v336_v61 = vld [vmem:[%s1123_s18 + $0x220] sm:$0xff] }
  0x67   : > { %v522_v31 = vadd.f32 %v506_v54, %v470_v18  ;;  %v368_v32 = vadd.f32 %v352_v5, %v316_v19  ;;  %v317_v33 = vadd.f32 %v301_v21, %v249_v20  ;;  %v405_v34 = vmul.f32 %v1145_v9, %v385_v17  ;;  %v232_v54 = vld [vmem:[%s1123_s18 + $0x210] sm:$0xff]  ;;  %v284_v60 = vld [vmem:[%s1123_s18 + $0x218] sm:$0xff]  ;;  %v388_v5 = vld [vmem:[%s1123_s18 + $0x228] sm:$0xff] }
  0x68   : > { %539 = vadd.xlane.f32.xlu1 %v520_v11  ;;  %v471_v37 = vadd.f32 %v455_v2, %v419_v25  ;;  %v250_v38 = vmul.f32 %v1134_v1, %v230_v22  ;;  %v302_v39 = vmul.f32 %v1137_v3, %v282_v23  ;;  %v354_v40 = vmul.f32 %v1141_v6, %v334_v24  ;;  %v233_v13 = vld [vmem:[%s1123_s18 + $0x240] sm:$0xff]  ;;  %v440_v20 = vld [vmem:[%s1123_s18 + $0x230] sm:$0xff]  ;;  %v492_v21 = vld [vmem:[%s1123_s18 + $0x238] sm:$0xff] }
  0x69   : > { %v420_v43 = vadd.f32 %v404_v15, %v368_v32  ;;  %v369_v44 = vadd.f32 %v353_v28, %v317_v33  ;;  %v457_v45 = vmul.f32 %v1149_v12, %v437_v29  ;;  %v509_v46 = vmul.f32 %v1153_v16, %v489_v30  ;;  %v337_v22 = vld [vmem:[%s1123_s18 + $0x250] sm:$0xff]  ;;  %v286_v33 = vld [vmem:[%s1123_s18 + $0x278] sm:$0xff] }
  0x6a   : > { %543 = vadd.xlane.f32.xlu2 %v522_v31  ;;  %v523_v50 = vadd.f32 %v507_v14, %v471_v37  ;;  %v318_v51 = vadd.f32 %v302_v39, %v250_v38  ;;  %v406_v52 = vmul.f32 %v1145_v9, %v386_v35  ;;  %v251_v53 = vmul.f32 %v1134_v1, %v231_v36  ;;  %v285_v14 = vld [vmem:[%s1123_s18 + $0x248] sm:$0xff]  ;;  %v234_v32 = vld [vmem:[%s1123_s18 + $0x270] sm:$0xff]  ;;  %v441_v39 = vld [vmem:[%s1123_s18 + $0x260] sm:$0xff] }
  0x6b   : > { %v472_v55 = vadd.f32 %v456_v26, %v420_v43  ;;  %v421_v56 = vadd.f32 %v405_v34, %v369_v44  ;;  %v303_v57 = vmul.f32 %v1137_v3, %v283_v41  ;;  %v355_v58 = vmul.f32 %v1141_v6, %v335_v42  ;;  %v338_v34 = vld [vmem:[%s1123_s18 + $0x280] sm:$0xff] }
  0x6c   : > { %545 = vadd.xlane.f32.xlu0 %v523_v50  ;;  %v370_v62 = vadd.f32 %v354_v40, %v318_v51  ;;  %v458_v63 = vmul.f32 %v1149_v12, %v438_v47  ;;  %v510_v0 = vmul.f32 %v1153_v16, %v490_v48  ;;  %v407_v2 = vmul.f32 %v1145_v9, %v387_v49  ;;  %v493_v40 = vld [vmem:[%s1123_s18 + $0x268] sm:$0xff] }
  0x6d   : > { %v524_v7 = vadd.f32 %v508_v27, %v472_v55  ;;  %v473_v8 = vadd.f32 %v457_v45, %v421_v56  ;;  %v319_v10 = vadd.f32 %v303_v57, %v251_v53  ;;  %v252_v11 = vmul.f32 %v1134_v1, %v232_v54  ;;  %v389_v27 = vld [vmem:[%s1123_s18 + $0x258] sm:$0xff]  ;;  %v390_v45 = vld [vmem:[%s1123_s18 + $0x288] sm:$0xff]  ;;  %v442_v57 = vld [vmem:[%s1123_s18 + $0x290] sm:$0xff] }
  0x6e   : > { %v422_v15 = vadd.f32 %v406_v52, %v370_v62  ;;  %v459_v17 = vmul.f32 %v1149_v12, %v439_v59  ;;  %v304_v18 = vmul.f32 %v1137_v3, %v284_v60  ;;  %v356_v19 = vmul.f32 %v1141_v6, %v336_v61  ;;  %v287_v51 = vld [vmem:[%s1123_s18 + $0x2a8] sm:$0xff]  ;;  %v339_v52 = vld [vmem:[%s1123_s18 + $0x2b0] sm:$0xff] }
  0x6f   : > { %v525_v23 = vadd.f32 %v509_v46, %v473_v8  ;;  %v371_v24 = vadd.f32 %v355_v58, %v319_v10  ;;  %v511_v25 = vmul.f32 %v1153_v16, %v491_v4  ;;  %v408_v26 = vmul.f32 %v1145_v9, %v388_v5  ;;  %v235_v46 = vld [vmem:[%s1123_s18 + $0x2a0] sm:$0xff]  ;;  %v391_v58 = vld [vmem:[%s1123_s18 + $0x2b8] sm:$0xff] }
  0x70   : > { %547 = vadd.xlane.f32.xlu1 %v524_v7  ;;  %v474_v28 = vadd.f32 %v458_v63, %v422_v15  ;;  %v320_v29 = vadd.f32 %v304_v18, %v252_v11  ;;  %v253_v30 = vmul.f32 %v1134_v1, %v233_v13  ;;  %v305_v31 = vmul.f32 %v1137_v3, %v285_v14  ;;  %v236_v63 = vld [vmem:[%s1123_s18 + $0x2d0] sm:$0xff]  ;;  %v494_v4 = vld [vmem:[%s1123_s18 + $0x298] sm:$0xff]  ;;  %v340_v10 = vld [vmem:[%s1123_s18 + $0x2e0] sm:$0xff] }
  0x71   : > { %v423_v35 = vadd.f32 %v407_v2, %v371_v24  ;;  %v460_v36 = vmul.f32 %v1149_v12, %v440_v20  ;;  %v512_v37 = vmul.f32 %v1153_v16, %v492_v21  ;;  %v357_v38 = vmul.f32 %v1141_v6, %v337_v22  ;;  %v288_v8 = vld [vmem:[%s1123_s18 + $0x2d8] sm:$0xff]  ;;  %v443_v15 = vld [vmem:[%s1123_s18 + $0x2c0] sm:$0xff]  ;;  %v392_v21 = vld [vmem:[%s1123_s18 + $0x2e8] sm:$0xff] }
  0x72   : > { %549 = vadd.xlane.f32.xlu2 %v525_v23  ;;  %v526_v41 = vadd.f32 %v510_v0, %v474_v28  ;;  %v372_v42 = vadd.f32 %v356_v19, %v320_v29  ;;  %v321_v43 = vadd.f32 %v305_v31, %v253_v30  ;;  %v409_v44 = vmul.f32 %v1145_v9, %v389_v27  ;;  %v495_v24 = vld [vmem:[%s1123_s18 + $0x2c8] sm:$0xff]  ;;  %v444_v30 = vld [vmem:[%s1123_s18 + $0x2f0] sm:$0xff] }
  0x73   : > { %v475_v47 = vadd.f32 %v459_v17, %v423_v35  ;;  %v254_v48 = vmul.f32 %v1134_v1, %v234_v32  ;;  %v306_v49 = vmul.f32 %v1137_v3, %v286_v33  ;;  %v358_v50 = vmul.f32 %v1141_v6, %v338_v34  ;;  %v496_v35 = vld [vmem:[%s1123_s18 + $0x2f8] sm:$0xff] }
  0x74   : > { %551 = vadd.xlane.f32.xlu0 %v526_v41  ;;  %v424_v53 = vadd.f32 %v408_v26, %v372_v42  ;;  %v373_v54 = vadd.f32 %v357_v38, %v321_v43  ;;  %v461_v55 = vmul.f32 %v1149_v12, %v441_v39  ;;  %v513_v56 = vmul.f32 %v1153_v16, %v493_v40 }
  0x75   : > { %v527_v59 = vadd.f32 %v511_v25, %v475_v47  ;;  %v322_v60 = vadd.f32 %v306_v49, %v254_v48  ;;  %v410_v61 = vmul.f32 %v1145_v9, %v390_v45  ;;  %v255_v62 = vmul.f32 %v1134_v1, %v235_v46 }
  0x76   : > { %v476_v0 = vadd.f32 %v460_v36, %v424_v53  ;;  %v425_v2 = vadd.f32 %v409_v44, %v373_v54  ;;  %v307_v5 = vmul.f32 %v1137_v3, %v287_v51  ;;  %v359_v7 = vmul.f32 %v1141_v6, %v339_v52 }
  0x77   : > { %v374_v11 = vadd.f32 %v358_v50, %v322_v60  ;;  %v462_v13 = vmul.f32 %v1149_v12, %v442_v57  ;;  %v411_v14 = vmul.f32 %v1145_v9, %v391_v58  ;;  %v256_v20 = vmul.f32 %v1134_v1, %v236_v63 }
  0x78   : > { %553 = vadd.xlane.f32.xlu1 %v527_v59  ;;  %v528_v17 = vadd.f32 %v512_v37, %v476_v0  ;;  %v477_v18 = vadd.f32 %v461_v55, %v425_v2  ;;  %v323_v19 = vadd.f32 %v307_v5, %v255_v62  ;;  %v514_v23 = vmul.f32 %v1153_v16, %v494_v4 }
  0x79   : > { %v426_v22 = vadd.f32 %v410_v61, %v374_v11  ;;  %v308_v25 = vmul.f32 %v1137_v3, %v288_v8  ;;  %v360_v26 = vmul.f32 %v1141_v6, %v340_v10  ;;  %v463_v29 = vmul.f32 %v1149_v12, %v443_v15 }
  0x7a   : > { %555 = vadd.xlane.f32.xlu2 %v528_v17  ;;  %v529_v27 = vadd.f32 %v513_v56, %v477_v18  ;;  %v375_v28 = vadd.f32 %v359_v7, %v323_v19  ;;  %v412_v1 = vmul.f32 %v1145_v9, %v392_v21  ;;  %v515_v34 = vmul.f32 %v1153_v16, %v495_v24 }
  0x7b   : > { %v478_v31 = vadd.f32 %v462_v13, %v426_v22  ;;  %v324_v32 = vadd.f32 %v308_v25, %v256_v20  ;;  %v464_v3 = vmul.f32 %v1149_v12, %v444_v30  ;;  %v516_v39 = vmul.f32 %v1153_v16, %v496_v35 }
  0x7c   : > { %557 = vadd.xlane.f32.xlu0 %v529_v27  ;;  %v427_v33 = vadd.f32 %v411_v14, %v375_v28  ;;  %v599_v43 = vlaneseq  ;;  %v1337_v45 = vstv %s565_s24  ;;  %vm636_vm8 = vcmask 654912  }
  0x7d   : > { %v530_v36 = vadd.f32 %v514_v23, %v478_v31  ;;  %v376_v37 = vadd.f32 %v360_v26, %v324_v32  ;;  %vm640_vm9 = vcmask 720512   ;;  %vm644_vm10 = vcmask 786112  }
  0x7e   : > { %v479_v6 = vadd.f32 %v463_v29, %v427_v33  ;;  %v1339_v46 = vand.u32 127, %v599_v43  ;;  %vm648_vm11 = vcmask 851712   ;;  %vm652_vm12 = vcmask 917312  }
  0x7f   : > { %v428_v38 = vadd.f32 %v412_v1, %v376_v37  ;;  %vm656_vm13 = vcmask 982912   ;;  %vm660_vm14 = vcmask 1048512  }
  0x80   : > { %559 = vadd.xlane.f32.xlu1 %v530_v36  ;;  %v531_v40 = vadd.f32 %v515_v34, %v479_v6  ;;  %v602_v48 = vadd.s32 4294967288, %v1339_v46  ;;  %v606_v16 = vadd.s32 4294967280, %v1339_v46  ;;  %v610_v52 = vadd.s32 4294967272, %v1339_v46 }
  0x81   : > { %v480_v41 = vadd.f32 %v464_v3, %v428_v38  ;;  %v614_v61 = vadd.s32 4294967264, %v1339_v46  ;;  %v618_v0 = vadd.s32 4294967256, %v1339_v46  ;;  %v622_v5 = vadd.s32 4294967248, %v1339_v46 }
  0x82   : > { %561 = vadd.xlane.f32.xlu2 %v531_v40  ;;  %v626_v14 = vadd.s32 4294967240, %v1339_v46  ;;  %v630_v20 = vadd.s32 4294967232, %v1339_v46  ;;  %v634_v24 = vadd.s32 4294967224, %v1339_v46  ;;  %v638_v29 = vadd.s32 4294967216, %v1339_v46 }
  0x83   : > { %v532_v42 = vadd.f32 %v516_v39, %v480_v41  ;;  %v642_v33 = vadd.s32 4294967208, %v1339_v46  ;;  %v646_v3 = vadd.s32 4294967200, %v1339_v46  ;;  %v650_v41 = vadd.s32 4294967192, %v1339_v46 }
  0x85   : > { %563 = vadd.xlane.f32.xlu0 %v532_v42 }
  0xcf   : > { %v534_v9 = vpop.xlane.xlu0 %533 }
  0xd0   : > { %v567_v12 = vadd.f32 %v1337_v45, %v534_v9 }
  0xd2   : > { %v601_v53 = vperm.slane %v567_v12, %v1339_v46 }
  0xd3   : > { %v538_v44 = vpop.xlane.xlu1 %537 }
  0xd4   : > { %v569_v50 = vadd.f32 %v1337_v45, %v538_v44 }
  0xd5   : > { %v542_v47 = vpop.xlane.xlu2 %541 }
  0xd6   : > { %v607_v57 = vperm.slane %v569_v50, %v606_v16  ;;  %v571_v62 = vadd.f32 %v1337_v45, %v542_v47  ;;  %v654_v47 = vadd.s32 4294967184, %v1339_v46 }
  0xd7   : > { %v536_v49 = vpop.xlane.xlu0 %535 }
  0xd8   : > { %v568_v51 = vadd.f32 %v1337_v45, %v536_v49  ;;  %v615_v10 = vperm.slane %v571_v62, %v614_v61 }
  0xda   : > { %v603_v54 = vperm.slane %v568_v51, %v602_v48  ;;  %v658_v51 = vadd.s32 4294967176, %v1339_v46 }
  0xdb   : > { %v540_v55 = vpop.xlane.xlu1 %539 }
  0xdc   : > { %v570_v56 = vadd.f32 %v1337_v45, %v540_v55  ;;  %v605_v58 = vsel %vm604_vm0, %v603_v54, %v601_v53 }
  0xdd   : > { %v544_v59 = vpop.xlane.xlu2 %543  ;;  %v609_v63 = vsel %vm608_vm1, %v607_v57, %v605_v58 }
  0xde   : > { %v611_v60 = vperm.slane %v570_v56, %v610_v52  ;;  %v572_v2 = vadd.f32 %v1337_v45, %v544_v59 }
  0xdf   : > { %v546_v4 = vpop.xlane.xlu0 %545 }
  0xe0   : > { %v573_v7 = vadd.f32 %v1337_v45, %v546_v4  ;;  %v613_v8 = vsel %vm612_vm2, %v611_v60, %v609_v63  ;;  %v619_v13 = vperm.slane %v572_v2, %v618_v0 }
  0xe1   : > { %v617_v17 = vsel %vm616_vm3, %v615_v10, %v613_v8 }
  0xe2   : > { %v623_v18 = vperm.slane %v573_v7, %v622_v5  ;;  %v621_v22 = vsel %vm620_vm4, %v619_v13, %v617_v17 }
  0xe3   : > { %v548_v11 = vpop.xlane.xlu1 %547 }
  0xe4   : > { %v574_v15 = vadd.f32 %v1337_v45, %v548_v11  ;;  %v625_v26 = vsel %vm624_vm5, %v623_v18, %v621_v22 }
  0xe5   : > { %v550_v19 = vpop.xlane.xlu2 %549 }
  0xe6   : > { %v575_v21 = vadd.f32 %v1337_v45, %v550_v19  ;;  %v627_v23 = vperm.slane %v574_v15, %v626_v14 }
  0xe7   : > { %v552_v25 = vpop.xlane.xlu0 %551 }
  0xe8   : > { %v576_v27 = vadd.f32 %v1337_v45, %v552_v25  ;;  %v631_v28 = vperm.slane %v575_v21, %v630_v20  ;;  %v629_v31 = vsel %vm628_vm6, %v627_v23, %v625_v26 }
  0xea   : > { %v635_v32 = vperm.slane %v576_v27, %v634_v24  ;;  %v633_v35 = vsel %vm632_vm7, %v631_v28, %v629_v31 }
  0xeb   : > { %v554_v30 = vpop.xlane.xlu1 %553 }
  0xec   : > { %v577_v1 = vadd.f32 %v1337_v45, %v554_v30  ;;  %v637_v6 = vsel %vm636_vm8, %v635_v32, %v633_v35 }
  0xed   : > { %v556_v34 = vpop.xlane.xlu2 %555 }
  0xee   : > { %v639_v36 = vperm.slane %v577_v1, %v638_v29  ;;  %v578_v37 = vadd.f32 %v1337_v45, %v556_v34 }
  0xef   : > { %v558_v38 = vpop.xlane.xlu0 %557 }
  0xf0   : > { %v579_v39 = vadd.f32 %v1337_v45, %v558_v38  ;;  %v643_v40 = vperm.slane %v578_v37, %v642_v33  ;;  %v641_v42 = vsel %vm640_vm9, %v639_v36, %v637_v6 }
  0xf2   : > { %v647_v9 = vperm.slane %v579_v39, %v646_v3  ;;  %v645_v12 = vsel %vm644_vm10, %v643_v40, %v641_v42 }
  0xf3   : > { %v560_v43 = vpop.xlane.xlu1 %559 }
  0xf4   : > { %v580_v44 = vadd.f32 %v1337_v45, %v560_v43  ;;  %v649_v16 = vsel %vm648_vm11, %v647_v9, %v645_v12 }
  0xf5   : > { %v562_v49 = vpop.xlane.xlu2 %561 }
  0xf6   : > { %v651_v48 = vperm.slane %v580_v44, %v650_v41  ;;  %v581_v50 = vadd.f32 %v1337_v45, %v562_v49 }
  0xf8   : > { %v655_v52 = vperm.slane %v581_v50, %v654_v47  ;;  %v564_v53 = vpop.xlane.xlu0 %563  ;;  %v653_v54 = vsel %vm652_vm12, %v651_v48, %v649_v16 }
  0xf9   : > { %v582_v55 = vadd.f32 %v1337_v45, %v564_v53 }
  0xfa   : > { %v657_v57 = vsel %vm656_vm13, %v655_v52, %v653_v54 }
  0xfb   : > { %v659_v56 = vperm.slane %v582_v55, %v658_v51 }
  0xfd   : > { %v661_v58 = vsel %vm660_vm14, %v659_v56, %v657_v57 }
  0xfe   : > { %663 = vst [vmem:[%s214_s23] sm:$0x1] %v661_v58 }
  0xff   : > { %926 = shalt.err (!%p923_p0)
}
 0x100   : > { %776 = dma.vmem_to_hbm [thread:$0]  (%p1050_p11), %s676_s28, 16, %s678_s5, %s665_s2  }
 0x101 PF: > { %s689_s9 = sand.u32 1, %s957_s14   ;;  %p1421_p3 = scmp.ne.s32.totalorder %s1416_s26, 0 }
 0x102   : > { %p1422_p5 = scmp.ge.s32.totalorder %s969_s17, 2  ;;  %s690_s10 = scalar_lea.sflag [#allocation5], %s689_s9 }
 0x104   : > { %p783_p8 = pnand %p1422_p5, %p1421_p3 }
 0x106   : > { %p784_p9 = pneg %p783_p8 }
 0x108   : > { %952 = dma.done.wait (%p784_p9), %s690_s10, 16  }
 0x109   : > { %954 = vsyncadd (%p784_p9), %s690_s10, 4294967280  ;;  %p18_p4 = scmp.ge.s32.totalorder %s1023_s19, 4   ;;  %s1423_s14 = smov %s961_s15 }
 0x10a   : > { %s1424_s15 = smov %s965_s16  ;;  %s1425_s16 = smov %s1035_s22 }
 0x10b   : > { %s1426_s17 = smov %s1023_s19  ;;  %20 = sbr.rel (!%p18_p4) target bundleno = 8 (0x8), region = 81 }
 0x110   :  { %695 = vsyncpa [#allocation4], 1 }
 0x111   :  { %697 = vsyncpa [#allocation4 + $0x1], 1 }
 0x112   :  { %698 = vsyncpa [#allocation7], 1 }
 0x113   :  { %699 = vsyncpa [#allocation5], 1 }
 0x114   :  { %701 = vsyncpa [#allocation5 + $0x1], 1 }

</bundles_post_ra>
